<compile_context>
chip_gen: v7x
topology: tpu7x:2x2x1
jax: 0.10.0
libtpu: 0.0.40
codegen_flags: <defaults>
</compile_context>

<pallas_src>
import functools

import jax
import jax.numpy as jnp
from jax.experimental import pallas as pl
from jax.experimental.pallas import tpu as pltpu


# ---------------------------------------------------------------------------
# Kernel
# ---------------------------------------------------------------------------
def _rmsnorm_kernel(x_ref, w_ref, o_ref, *, eps, inv_dim):
    # x_ref: (TM, D) input tile, w_ref: (1, D) resident f32 weight, o_ref: (TM, D).
    x = x_ref[...].astype(jnp.float32)                           # x.float()
    ms = jnp.sum(x * x, axis=-1, keepdims=True) * inv_dim        # mean(x^2): XLU sum + const mul
    inv = jax.lax.rsqrt(ms + eps)                                # EUP rsqrt
    # .type_as(x): round back to the input dtype before the weight multiply
    # (bit-exact torch semantics; the cast is VPU filler under the DMA roofline).
    normed = (x * inv).astype(x_ref.dtype)
    o_ref[...] = (w_ref[...] * normed.astype(jnp.float32)).astype(o_ref.dtype)


# ---------------------------------------------------------------------------
# Tiling / VMEM sizing helpers
# ---------------------------------------------------------------------------
def _round_up(x, m):
    return ((x + m - 1) // m) * m


def _vmem_capacity_bytes():
    """Physical VMEM per TensorCore; conservative fallback = 64 MiB (v7x)."""
    try:
        info = pltpu.get_tpu_info()
        cap = getattr(info, "vmem_capacity_bytes", None)
        if cap:
            return int(cap)
    except Exception:
        pass
    return 64 * 1024 * 1024


def _pick_block_rows(rows, dim, xb, ob, vmem_cap):
    """Row-tile size: ~8 MiB in+out per step, honest VMEM accounting, >=4 even steps."""
    # Sublane-packing multiple of the narrowest dtype (f32 -> 8, bf16 -> 16) so
    # loads/stores are full unmasked transfers on the row axis.
    mult = max(32 // min(xb, ob), 8)

    io_per_row = dim * (xb + ob)
    # Accounted per-row VMEM: double-buffered in + out tiles, plus ~3 f32-sized
    # temporaries (x_f32, x*x, normed/product) the kernel may materialize.
    vmem_per_row = dim * (2 * xb + 2 * ob + 3 * 4)

    target_io_bytes = 8 * 1024 * 1024            # per-step in+out footprint
    vmem_budget = int(vmem_cap * 0.5)            # leave half of VMEM as headroom

    block_rows = min(target_io_bytes // io_per_row, vmem_budget // vmem_per_row)
    block_rows = max((block_rows // mult) * mult, mult)

    # Keep the grid at >=4 steps (>=2 per TC on v7x) with an even count when rows
    # permit; single-TC chips get >=3 steps of pipelining for free this way.
    if rows >= 4 * mult:
        cap = max((((rows - 1) // 3) // mult) * mult, mult)      # => cdiv(rows, b) >= 4
        block_rows = min(block_rows, cap)
        steps = pl.cdiv(rows, block_rows)
        if steps % 2 == 1 and block_rows > mult:
            alt = max((((rows - 1) // steps) // mult) * mult, mult)
            if pl.cdiv(rows, alt) % 2 == 0:
                block_rows = alt

    # Never exceed what a single (mult-aligned) block needs to cover all rows.
    return min(block_rows, _round_up(rows, mult))


# ---------------------------------------------------------------------------
# Wrapper
# ---------------------------------------------------------------------------
def rmsnorm(x, weight, eps=1e-6):
    """RMSNorm over the last axis of `x`, matching the PyTorch module's forward."""
    orig_shape = x.shape
    dim = orig_shape[-1]
    rows = 1
    for s in orig_shape[:-1]:
        rows *= s

    # torch promotion: weight * normed -> promote(weight.dtype, x.dtype)
    out_dtype = jnp.promote_types(x.dtype, weight.dtype)

    xb = jnp.dtype(x.dtype).itemsize
    ob = jnp.dtype(out_dtype).itemsize

    x2d = x.reshape(rows, dim)
    w2d = weight.astype(jnp.float32).reshape(1, dim)   # pre-cast once; stays resident

    vmem_cap = _vmem_capacity_bytes()
    block_rows = _pick_block_rows(rows, dim, xb, ob, vmem_cap)
    grid = (pl.cdiv(rows, block_rows),)                # no padding; last block masked

    # Scoped VMEM limit: accounted footprint + headroom, never near physical cap.
    accounted = block_rows * dim * (2 * xb + 2 * ob + 3 * 4) + dim * 4
    vmem_limit = min(max(accounted + (8 << 20), 32 << 20), int(vmem_cap * 0.8))

    cost = pl.CostEstimate(
        flops=4 * rows * dim,
        transcendentals=rows,
        bytes_accessed=rows * dim * (xb + ob) + dim * 4,
    )

    # TODO(synk): if dim is narrow / not a multiple of 128, fold rows into the
    # lane axis for lane-dense stores; typical hidden sizes don't need it.
    out2d = pl.pallas_call(
        functools.partial(_rmsnorm_kernel, eps=float(eps), inv_dim=1.0 / dim),
        out_shape=jax.ShapeDtypeStruct((rows, dim), out_dtype),
        grid_spec=pltpu.PrefetchScalarGridSpec(
            num_scalar_prefetch=0,
            grid=grid,
            in_specs=[
                pl.BlockSpec((block_rows, dim), lambda i: (i, 0)),
                pl.BlockSpec((1, dim), lambda i: (0, 0)),   # weight stays resident
            ],
            out_specs=pl.BlockSpec((block_rows, dim), lambda i: (i, 0)),
        ),
        compiler_params=pltpu.CompilerParams(
            dimension_semantics=("parallel",),
            vmem_limit_bytes=vmem_limit,
        ),
        cost_estimate=cost,
    )(x2d, w2d)

    return out2d.reshape(orig_shape[:-1] + (dim,))


# ---------------------------------------------------------------------------
# Pure-JAX reference (mirrors the torch forward exactly)
# ---------------------------------------------------------------------------
def rmsnorm_ref(x, weight, eps=1e-6):
    xf = x.astype(jnp.float32)
    normed = (xf * jax.lax.rsqrt(jnp.mean(xf * xf, axis=-1, keepdims=True) + eps)
              ).astype(x.dtype)
    out_dtype = jnp.promote_types(x.dtype, weight.dtype)
    return (weight.astype(jnp.float32) * normed.astype(jnp.float32)).astype(out_dtype)


if __name__ == "__main__":
    key = jax.random.PRNGKey(0)

    # Test 1: f32, evenly tiled shape (batch=2, seq=8, hidden=128).
    batch, seq, hidden = 2, 8, 128
    x = jax.random.normal(key, (batch, seq, hidden), dtype=jnp.float32)
    weight = jnp.ones((hidden,), dtype=jnp.float32)  # RMSNorm init: ones

    out = jax.block_until_ready(rmsnorm(x, weight, eps=1e-6))
    ref = rmsnorm_ref(x, weight, eps=1e-6)
    assert out.shape == x.shape and out.dtype == ref.dtype
    assert jnp.allclose(out, ref, atol=1e-5, rtol=1e-5)

    # Test 2: bf16 input with ragged row count (3*37 = 111 rows -> masked partial
    # last block, no padding pass) and f32 weight (dtype promotion).
    k2 = jax.random.PRNGKey(1)
    x_bf = jax.random.normal(k2, (3, 37, 256), dtype=jnp.bfloat16)
    w_bf = jnp.ones((256,), dtype=jnp.float32)
    out_bf = jax.block_until_ready(rmsnorm(x_bf, w_bf, eps=1e-6))
    ref_bf = rmsnorm_ref(x_bf, w_bf, eps=1e-6)
    assert out_bf.shape == x_bf.shape and out_bf.dtype == ref_bf.dtype
    assert jnp.allclose(out_bf.astype(jnp.float32), ref_bf.astype(jnp.float32),
                        atol=2e-2, rtol=2e-2)

    # Test 3: tiny row count smaller than the sublane multiple (rows=5).
    k3 = jax.random.PRNGKey(2)
    x_sm = jax.random.normal(k3, (5, 128), dtype=jnp.float32)
    w_sm = jax.random.normal(jax.random.PRNGKey(3), (128,), dtype=jnp.float32)
    out_sm = jax.block_until_ready(rmsnorm(x_sm, w_sm, eps=1e-6))
    ref_sm = rmsnorm_ref(x_sm, w_sm, eps=1e-6)
    assert jnp.allclose(out_sm, ref_sm, atol=1e-5, rtol=1e-5)

    print("KERNEL_OK")
</pallas_src>

<mosaic_0001>
module attributes {stable_mosaic.version = 11 : i64} {
  func.func @_rmsnorm_kernel(%arg0: i32, %arg1: memref<16x128xf32, #tpu.memory_space<vmem>>, %arg2: memref<1x128xf32, #tpu.memory_space<vmem>>, %arg3: memref<16x128xf32, #tpu.memory_space<vmem>>) attributes {dimension_semantics = [#tpu.dimension_semantics<parallel>], iteration_bounds = array<i64: 1>, scalar_prefetch = 0 : i64, scratch_operands = 0 : i64, tpu.core_type = #tpu.core_type<tc>, window_params = [{transform_indices = @transform_0, window_bounds = array<i64: 16, 128>}, {pipeline_mode = #tpu.pipeline_mode<synchronous>, transform_indices = @transform_1, window_bounds = array<i64: 1, 128>}, {transform_indices = @transform_2, window_bounds = array<i64: 16, 128>}]} {
    %c0 = arith.constant 0 : index
    %c0_0 = arith.constant 0 : index
    %0 = vector.load %arg1[%c0, %c0_0] : memref<16x128xf32, #tpu.memory_space<vmem>>, vector<16x128xf32>
    %1 = arith.mulf %0, %0 : vector<16x128xf32>
    %cst = arith.constant dense<0.000000e+00> : vector<16xf32>
    %2 = vector.multi_reduction <add>, %1, %cst [1] : vector<16x128xf32> to vector<16xf32>
    %3 = vector.shape_cast %2 : vector<16xf32> to vector<16x1xf32>
    %cst_1 = arith.constant 7.812500e-03 : f32
    %4 = vector.broadcast %cst_1 : f32 to vector<16x1xf32>
    %5 = arith.mulf %3, %4 : vector<16x1xf32>
    %cst_2 = arith.constant 9.99999997E-7 : f32
    %6 = vector.broadcast %cst_2 : f32 to vector<16x1xf32>
    %7 = arith.addf %5, %6 : vector<16x1xf32>
    %8 = math.rsqrt %7 : vector<16x1xf32>
    %9 = vector.broadcast %8 : vector<16x1xf32> to vector<16x128xf32>
    %10 = arith.mulf %0, %9 : vector<16x128xf32>
    %c0_3 = arith.constant 0 : index
    %c0_4 = arith.constant 0 : index
    %11 = vector.load %arg2[%c0_3, %c0_4] : memref<1x128xf32, #tpu.memory_space<vmem>>, vector<1x128xf32>
    %12 = vector.broadcast %11 : vector<1x128xf32> to vector<16x128xf32>
    %13 = arith.mulf %12, %10 : vector<16x128xf32>
    %c0_5 = arith.constant 0 : index
    %c0_6 = arith.constant 0 : index
    %14 = vector.load %arg3[%c0_5, %c0_6] : memref<16x128xf32, #tpu.memory_space<vmem>>, vector<16x128xf32>
    tpu.vector_store %arg3[%c0_5, %c0_6], %13 {strides = array<i32>} : memref<16x128xf32, #tpu.memory_space<vmem>>, vector<16x128xf32>,
    return
  }
  func.func @transform_0(%arg0: i32) -> (i32, i32) {
    %c0_i32 = arith.constant 0 : i32
    %c0_i32_0 = arith.constant 0 : i32
    return %arg0, %c0_i32 : i32, i32
  }
  func.func @transform_1(%arg0: i32) -> (i32, i32) {
    %c0_i32 = arith.constant 0 : i32
    %c0_i32_0 = arith.constant 0 : i32
    %c0_i32_1 = arith.constant 0 : i32
    return %c0_i32, %c0_i32_0 : i32, i32
  }
  func.func @transform_2(%arg0: i32) -> (i32, i32) {
    %c0_i32 = arith.constant 0 : i32
    %c0_i32_0 = arith.constant 0 : i32
    return %arg0, %c0_i32 : i32, i32
  }
}

</mosaic_0001>

<bundles_post_ra>
// kernel: tpu_custom_call.1
= control target key start
LH: loop header
LB: loop body
LE: loop exit
PB: predicated region body
PF: predicated region fallthrough
CT: control target
= control target key end

     0   :  { %7 = vsyncpa [#allocation3], 0  ;;  %s179_s0 = inlined_call_operand.hbm [shape: f32[16,128], index: 0, kind: input, shape index: {}]   ;;  %s180_s1 = inlined_call_operand.vmem [shape: f32[1,128], index: 1, kind: input, shape index: {}]   ;;  %s181_s2 = inlined_call_operand.hbm [shape: f32[16,128], index: 2, kind: output, shape index: {}]  }
   0x1   :  { %8 = vsyncpa [#allocation4], 0  ;;  %s127_s9 = smov [#allocation2]   ;;  %s79_s13 = scalar_lea.hbm %s179_s0, 256 }
   0x2   :  { %s14_s10 = sshll.u32 %s127_s9, 4  ;;  %p80_p0 = scmp.ne.s32.totalorder %s179_s0, %s79_s13  ;;  %s15_s10 = int_to_ptr.vmem [resolvable:$true] %s14_s10 }
   0x3   :  { %p83_p1 = scmp.lt.u32.totalorder %s79_s13, %s179_s0 }
   0x5   :  { %p85_p2 = pnand %p83_p1, %p80_p0 }
   0x7   :  { %88 = shalt.err (!%p85_p2)
}
   0x8   :  { %s89_s18 = scalar_lea.vmem %s15_s10, 256  ;;  %p94_p4 = scmp.lt.s32.totalorder %s15_s10, %s15_s10 }
   0x9   :  { %p90_p3 = scmp.ne.s32.totalorder %s15_s10, %s89_s18  ;;  %p95_p5 = scmp.lt.s32.totalorder %s89_s18, %s89_s18 }
   0xb   :  { %p96_p6 = por %p95_p5, %p94_p4 }
   0xd   :  { %p97_p7 = pnand %p96_p6, %p90_p3 }
   0xf   :  { %100 = shalt.err (!%p97_p7)
}
  0x10   :  { %s128_s19 = smov 128   ;;  %s129_s20 = smov 8  }
  0x11   :  { %20 = dma.hbm_to_vmem [thread:$0]  %s179_s0, 256, %s15_s10, [#allocation3], %s128_s19, %s128_s19, %s129_s20  }
  0x12   :  { %123 = dma.done.wait [#allocation3], 256  }
  0x13   :  { %124 = vsyncadd [#allocation3], 4294967040  ;;  %v26_v0 = vld [vmem:[#allocation2] sm:$0xff]  ;;  %v27_v1 = vld [vmem:[#allocation2 + $0x8] sm:$0xff]  ;;  %s130_s0 = smov [#allocation5]  }
  0x14   :  { %v28_v2 = vmul.f32 %v26_v0, %v26_v0  ;;  %v29_v3 = vmul.f32 %v27_v1, %v27_v1  ;;  %v70_v11 = vld [vmem:[%s180_s1] ss:$0 sm:$0xff]  ;;  %s58_s25 = sshll.u32 %s130_s0, 4  ;;  %s59_s25 = int_to_ptr.vmem [resolvable:$true] %s58_s25 }
  0x15   :  { %s101_s26 = scalar_lea.vmem %s59_s25, 256  ;;  %p106_p9 = scmp.lt.s32.totalorder %s59_s25, %s59_s25 }
  0x16   :  { %30 = vadd.xlane.f32.xlu0 %v28_v2  ;;  %p102_p8 = scmp.ne.s32.totalorder %s59_s25, %s101_s26  ;;  %p107_p10 = scmp.lt.s32.totalorder %s101_s26, %s101_s26 }
  0x18   :  { %p108_p11 = por %p107_p10, %p106_p9 }
  0x1a   :  { %32 = vadd.xlane.f32.xlu0 %v29_v3  ;;  %p109_p12 = pnand %p108_p11, %p102_p8 }
  0xa3   :  { %v31_v4 = vpop.xlane.xlu0 %30 }
  0xa4   :  { %v34_v5 = vmul.f32 0.0078125, %v31_v4 }
  0xa6   :  { %v36_v6 = vadd.f32 1e-06, %v34_v5 }
  0xa7   :  { %v33_v7 = vpop.xlane.xlu0 %32 }
  0xa8   :  { %75 = vrsqrt.f32 %v36_v6  ;;  %v35_v8 = vmul.f32 0.0078125, %v33_v7 }
  0xaa   :  { %v37_v9 = vadd.f32 1e-06, %v35_v8 }
  0xac   :  { %77 = vrsqrt.f32 %v37_v9 }
  0xb2   :  { %v76_v10 = vpop.eup %75 }
  0xb3   :  { %v40_v12 = vmul.f32 %v76_v10, %v26_v0 }
  0xb5   :  { %v49_v13 = vmul.f32 %v70_v11, %v40_v12 }
  0xb6   :  { %v78_v14 = vpop.eup %77 }
  0xb7   :  { %v41_v15 = vmul.f32 %v78_v14, %v27_v1  ;;  %51 = vst [vmem:[#allocation5] sm:$0xff] %v49_v13 }
  0xb9   :  { %v50_v16 = vmul.f32 %v70_v11, %v41_v15 }
  0xbb   :  { %52 = vst [vmem:[#allocation5 + $0x8] sm:$0xff] %v50_v16 }
  0xbc   :  { %112 = shalt.err (!%p109_p12)
}
  0xbd   :  { %s113_s1 = scalar_lea.hbm %s181_s2, 256 }
  0xbe   :  { %p114_p13 = scmp.ne.s32.totalorder %s181_s2, %s113_s1  ;;  %p117_p0 = scmp.lt.u32.totalorder %s113_s1, %s181_s2 }
  0xc0   :  { %p119_p1 = pnand %p117_p0, %p114_p13 }
  0xc2   :  { %122 = shalt.err (!%p119_p1)
}
  0xc3   :  { %64 = dma.vmem_to_hbm [thread:$0]  %s59_s25, 256, %s181_s2, [#allocation4], %s128_s19, %s128_s19, %s129_s20  }
  0xc4   :  { %125 = dma.done.wait [#allocation4], 256  }
  0xc5   :  { %126 = vsyncadd [#allocation4], 4294967040 }
  0xc6   :  { %68 = vsyncpa [#allocation3], 1 }
  0xc7   :  { %69 = vsyncpa [#allocation4], 1 }

</bundles_post_ra>
